<compile_context>
chip_gen: v7x
topology: tpu7x:2x2x1
jax: 0.10.0
libtpu: 0.0.40
codegen_flags: <defaults>
</compile_context>

<pallas_src>
import functools

import jax
import jax.numpy as jnp
from jax.experimental import pallas as pl
from jax.experimental.pallas import tpu as pltpu

_MIB = 1024 * 1024


def _mase_partial_kernel(insample_ref, forecast_ref, target_ref, mask_ref, o_ref, *, freq):
    """One batch tile -> a single f32 partial numerator sum (global mean finished outside).

    insample_ref : (tb, T_i)   native dtype in VMEM (upcast in-kernel)
    forecast_ref : (tb, T_o)
    target_ref   : (tb, T_o)
    mask_ref     : (tb, T_o)   any {0,1} mask dtype (int8 / bool / float)
    o_ref        : (1, 1, 1)   f32 partial sum for this tile
    """
    t_in = insample_ref.shape[1]

    # Upcast after load: HBM traffic stays at the caller's dtype width.
    x = insample_ref[...].astype(jnp.float32)             # (tb, T_i)
    forecast = forecast_ref[...].astype(jnp.float32)      # (tb, T_o)
    target = target_ref[...].astype(jnp.float32)
    mask = mask_ref[...].astype(jnp.float32)

    # Seasonal-naive scale: mean_j |x[:, j+freq] - x[:, j]| (fold the divide into a multiply).
    # TODO(synk): a pltpu.roll + iota-mask variant would trade the two lane-offset slice
    # relayouts for one XLU rotate; the VPU work is hidden under the DMA in this HBM-bound
    # kernel, so keep the value-slice form which lowers for arbitrary T_i.
    diff = jnp.abs(x[:, freq:] - x[:, :-freq])             # (tb, T_i - freq)
    denom = jnp.sum(diff, axis=1, keepdims=True) * jnp.float32(1.0 / (t_in - freq))  # (tb, 1)

    # divide_no_nan(mask, denom) == mask * guard(1/denom) for a {0,1} mask.  denom >= 0 by
    # construction, so `denom > 0` excludes the 0 and NaN cases; reciprocal(inf) is already 0.
    # Keep approx=False: the EUP approximation (~2^-12 rel. error) would break tight tolerances.
    inv = jnp.where(denom > 0, pl.reciprocal(denom, approx=False), jnp.float32(0.0))  # (tb, 1)

    contrib = jnp.abs(forecast - target) * (mask * inv)    # (tb, T_o)

    # Full per-tile reduction (lanes on the otherwise-idle XLU, then sublanes) so the output
    # writeback is one element per tile instead of a masked (1, T_o) partial row store.
    s = jnp.sum(contrib, axis=1, keepdims=True)            # (tb, 1)
    o_ref[...] = jnp.sum(s, axis=0, keepdims=True).reshape(1, 1, 1)


def _round_up(x, m):
    return ((x + m - 1) // m) * m


def _cdiv(a, b):
    return (a + b - 1) // b


def _lane_pad(t):
    return _round_up(t, 128)


def mase_loss(insample, freq, forecast, target, mask, *,
              max_batch_tile=None, vmem_limit_bytes=None):
    """MASE loss via a batch-tiled Pallas TPU kernel. `freq` must be a static Python int.

    Inputs may be any float dtype (bf16 halves HBM traffic) and `mask` may be bool/int8/float;
    the kernel upcasts to f32 inside VMEM, so HBM bytes stay at the caller's dtype width.
    """
    freq = int(freq)
    B, T_i = insample.shape
    _, T_o = forecast.shape
    assert 0 < freq < T_i, "freq must satisfy 0 < freq < insample time length"

    # Per-generation scoped-VMEM budget: half of physical VMEM, capped at 64 MiB.
    # v7x (64 MiB/TC) -> 32 MiB; v5e/v6e (128 MiB) -> 64 MiB (avoids v5e's 16 MiB default).
    if vmem_limit_bytes is None:
        try:
            vmem_cap = int(pltpu.get_tpu_info().vmem_capacity_bytes)
        except Exception:  # conservative fallback if the query is unavailable
            vmem_cap = 64 * _MIB
        vmem_limit_bytes = max(32 * _MIB, min(vmem_cap // 2, 64 * _MIB))

    def _isize(a):
        return jnp.dtype(a.dtype).itemsize

    # Dtype- and lane-padding-aware per-row VMEM footprint:
    #   2x (double-buffered) input blocks at their HBM dtype, rows padded to 128 lanes,
    #   plus the in-kernel f32 temporaries (upcast x / diff / forecast / target / contrib).
    io_row = 2 * (_lane_pad(T_i) * _isize(insample)
                  + _lane_pad(T_o) * (_isize(forecast) + _isize(target) + _isize(mask)))
    tmp_row = 4 * (2 * _lane_pad(T_i) + 3 * _lane_pad(T_o))
    bytes_per_row = io_row + tmp_row
    budget = int(vmem_limit_bytes * 0.8)          # headroom for compiler-internal scratch
    tb_cap = max(8, (budget // bytes_per_row) // 8 * 8)

    # Size the batch tile so each grid step moves >= ~2 MiB of HBM traffic: the fixed
    # per-step pipeline overhead otherwise dominates at small T (worst on v7x's 3.2 TB/s HBM).
    if max_batch_tile is None:
        hbm_row = (T_i * _isize(insample)
                   + T_o * (_isize(forecast) + _isize(target) + _isize(mask)))
        tb_dma = _round_up(_cdiv(2 * _MIB, hbm_row), 8)
        max_batch_tile = max(512, min(4096, tb_dma))

    tb = min(max_batch_tile, tb_cap, _round_up(B, 8))
    # Keep at least 2 grid tiles when B allows it so dimension_semantics=("parallel",)
    # can shard the batch grid across both of v7x's TensorCores (no effect on v5e/v6e).
    if B > 8:
        tb = min(tb, _round_up(_cdiv(B, 2), 8))
    tb = max(8, (tb // 8) * 8)

    n_tiles = _cdiv(B, tb)
    b_pad = n_tiles * tb
    if b_pad != B:
        pad = ((0, b_pad - B), (0, 0))
        # Zero padding is inert: padded rows have denom == 0 (guarded to 0), zero
        # |forecast - target| and zero mask, so they contribute nothing to the sums.
        insample = jnp.pad(insample, pad)
        forecast = jnp.pad(forecast, pad)
        target = jnp.pad(target, pad)
        mask = jnp.pad(mask, pad)

    kernel = functools.partial(_mase_partial_kernel, freq=freq)
    partials = pl.pallas_call(
        kernel,
        out_shape=jax.ShapeDtypeStruct((n_tiles, 1, 1), jnp.float32),
        grid=(n_tiles,),
        in_specs=[
            pl.BlockSpec((tb, T_i), lambda i: (i, 0)),     # time kept whole: no halo needed
            pl.BlockSpec((tb, T_o), lambda i: (i, 0)),
            pl.BlockSpec((tb, T_o), lambda i: (i, 0)),
            pl.BlockSpec((tb, T_o), lambda i: (i, 0)),
        ],
        out_specs=pl.BlockSpec((1, 1, 1), lambda i: (i, 0, 0)),
        compiler_params=pltpu.CompilerParams(
            dimension_semantics=("parallel",),             # shard batch tiles across TCs (v7x)
            vmem_limit_bytes=int(vmem_limit_bytes),
        ),
    )(insample, forecast, target, mask)

    # Finish the global mean with the true (unpadded) element count.
    return jnp.sum(partials) * (1.0 / (B * T_o))


def _mase_loss_ref(insample, freq, forecast, target, mask):
    """Pure-JAX reference mirroring the PyTorch module (f32 compute)."""
    insample = insample.astype(jnp.float32)
    forecast = forecast.astype(jnp.float32)
    target = target.astype(jnp.float32)
    mask = mask.astype(jnp.float32)
    denom = jnp.mean(jnp.abs(insample[:, freq:] - insample[:, :-freq]), axis=1)
    r = mask / denom[:, None]
    r = jnp.where(jnp.isnan(r) | jnp.isinf(r), 0.0, r)
    return jnp.mean(jnp.abs(forecast - target) * r)


if __name__ == "__main__":
    key = jax.random.PRNGKey(0)
    k1, k2, k3, k4 = jax.random.split(key, 4)

    # Small test matching the PyTorch module's call signature.
    B, T_i, T_o, FREQ = 2, 16, 8, 2
    insample = jax.random.normal(k1, (B, T_i), dtype=jnp.float32)
    # Row 0 constant -> zero seasonal denominator -> exercises the divide_no_nan path.
    insample = insample.at[0].set(1.0)
    forecast = jax.random.normal(k2, (B, T_o), dtype=jnp.float32)
    target = jax.random.normal(k3, (B, T_o), dtype=jnp.float32)
    mask = (jax.random.uniform(k4, (B, T_o)) > 0.3).astype(jnp.float32)

    loss = jax.block_until_ready(mase_loss(insample, FREQ, forecast, target, mask))
    ref = _mase_loss_ref(insample, FREQ, forecast, target, mask)
    assert jnp.allclose(loss, ref, rtol=1e-5, atol=1e-6), (loss, ref)

    # Multi-tile path: >= 2 grid tiles (v7x megacore), ragged batch padding, and a cheap
    # int8 mask (kernel upcasts in VMEM; mask HBM traffic drops to 1 B/element).
    k5, k6, k7, k8 = jax.random.split(jax.random.PRNGKey(1), 4)
    B2, T_i2, T_o2, FREQ2 = 300, 64, 24, 7
    insample2 = jax.random.normal(k5, (B2, T_i2), dtype=jnp.float32)
    forecast2 = jax.random.normal(k6, (B2, T_o2), dtype=jnp.float32)
    target2 = jax.random.normal(k7, (B2, T_o2), dtype=jnp.float32)
    mask2 = (jax.random.uniform(k8, (B2, T_o2)) > 0.3).astype(jnp.int8)

    loss2 = jax.block_until_ready(mase_loss(insample2, FREQ2, forecast2, target2, mask2))
    ref2 = _mase_loss_ref(insample2, FREQ2, forecast2, target2, mask2)
    assert jnp.allclose(loss2, ref2, rtol=1e-5, atol=1e-6), (loss2, ref2)

    print("KERNEL_OK")
</pallas_src>

<mosaic_0001>
module attributes {stable_mosaic.version = 11 : i64} {
  func.func @_mase_partial_kernel(%arg0: i32, %arg1: memref<8x16xf32, #tpu.memory_space<vmem>>, %arg2: memref<8x8xf32, #tpu.memory_space<vmem>>, %arg3: memref<8x8xf32, #tpu.memory_space<vmem>>, %arg4: memref<8x8xf32, #tpu.memory_space<vmem>>, %arg5: memref<1x1x1xf32, #tpu.memory_space<vmem>>) attributes {dimension_semantics = [#tpu.dimension_semantics<parallel>], iteration_bounds = array<i64: 1>, scalar_prefetch = 0 : i64, scratch_operands = 0 : i64, tpu.core_type = #tpu.core_type<tc>, window_params = [{transform_indices = @transform_0, window_bounds = array<i64: 8, 16>}, {transform_indices = @transform_1, window_bounds = array<i64: 8, 8>}, {transform_indices = @transform_2, window_bounds = array<i64: 8, 8>}, {transform_indices = @transform_3, window_bounds = array<i64: 8, 8>}, {transform_indices = @transform_4, window_bounds = array<i64: 1, 1, 1>}]} {
    %c0 = arith.constant 0 : index
    %c0_0 = arith.constant 0 : index
    %0 = vector.load %arg1[%c0, %c0_0] : memref<8x16xf32, #tpu.memory_space<vmem>>, vector<8x16xf32>
    %c0_1 = arith.constant 0 : index
    %c0_2 = arith.constant 0 : index
    %1 = vector.load %arg2[%c0_1, %c0_2] : memref<8x8xf32, #tpu.memory_space<vmem>>, vector<8x8xf32>
    %c0_3 = arith.constant 0 : index
    %c0_4 = arith.constant 0 : index
    %2 = vector.load %arg3[%c0_3, %c0_4] : memref<8x8xf32, #tpu.memory_space<vmem>>, vector<8x8xf32>
    %c0_5 = arith.constant 0 : index
    %c0_6 = arith.constant 0 : index
    %3 = vector.load %arg4[%c0_5, %c0_6] : memref<8x8xf32, #tpu.memory_space<vmem>>, vector<8x8xf32>
    %4 = vector.extract_strided_slice %0 {offsets = [0, 2], sizes = [8, 14], strides = [1, 1]} : vector<8x16xf32> to vector<8x14xf32>
    %5 = vector.extract_strided_slice %0 {offsets = [0, 0], sizes = [8, 14], strides = [1, 1]} : vector<8x16xf32> to vector<8x14xf32>
    %6 = arith.subf %4, %5 : vector<8x14xf32>
    %7 = math.absf %6 : vector<8x14xf32>
    %cst = arith.constant dense<0.000000e+00> : vector<8xf32>
    %8 = vector.multi_reduction <add>, %7, %cst [1] : vector<8x14xf32> to vector<8xf32>
    %9 = vector.shape_cast %8 : vector<8xf32> to vector<8x1xf32>
    %cst_7 = arith.constant 0.0714285746 : f32
    %10 = vector.broadcast %cst_7 : f32 to vector<8x1xf32>
    %11 = arith.mulf %9, %10 : vector<8x1xf32>
    %cst_8 = arith.constant 0.000000e+00 : f32
    %12 = vector.broadcast %cst_8 : f32 to vector<8x1xf32>
    %13 = arith.cmpf ogt, %11, %12 : vector<8x1xf32>
    %14 = tpu.reciprocal %11 : vector<8x1xf32> -> vector<8x1xf32>
    %cst_9 = arith.constant 0.000000e+00 : f32
    %15 = vector.broadcast %cst_9 : f32 to vector<8x1xf32>
    %16 = arith.select %13, %14, %15 : vector<8x1xi1>, vector<8x1xf32>
    %17 = arith.subf %1, %2 : vector<8x8xf32>
    %18 = math.absf %17 : vector<8x8xf32>
    %19 = vector.broadcast %16 : vector<8x1xf32> to vector<8x8xf32>
    %20 = arith.mulf %3, %19 : vector<8x8xf32>
    %21 = arith.mulf %18, %20 : vector<8x8xf32>
    %cst_10 = arith.constant dense<0.000000e+00> : vector<8xf32>
    %22 = vector.multi_reduction <add>, %21, %cst_10 [1] : vector<8x8xf32> to vector<8xf32>
    %23 = vector.shape_cast %22 : vector<8xf32> to vector<8x1xf32>
    %cst_11 = arith.constant dense<0.000000e+00> : vector<1xf32>
    %24 = vector.multi_reduction <add>, %23, %cst_11 [0] : vector<8x1xf32> to vector<1xf32>
    %25 = vector.shape_cast %24 : vector<1xf32> to vector<1x1xf32>
    %26 = vector.shape_cast %25 : vector<1x1xf32> to vector<1x1x1xf32>
    %c0_12 = arith.constant 0 : index
    %c0_13 = arith.constant 0 : index
    %c0_14 = arith.constant 0 : index
    %27 = vector.load %arg5[%c0_12, %c0_13, %c0_14] : memref<1x1x1xf32, #tpu.memory_space<vmem>>, vector<1x1x1xf32>
    tpu.vector_store %arg5[%c0_12, %c0_13, %c0_14], %26 {strides = array<i32>} : memref<1x1x1xf32, #tpu.memory_space<vmem>>, vector<1x1x1xf32>,
    return
  }
  func.func @transform_0(%arg0: i32) -> (i32, i32) {
    %c0_i32 = arith.constant 0 : i32
    %c0_i32_0 = arith.constant 0 : i32
    return %arg0, %c0_i32 : i32, i32
  }
  func.func @transform_1(%arg0: i32) -> (i32, i32) {
    %c0_i32 = arith.constant 0 : i32
    %c0_i32_0 = arith.constant 0 : i32
    return %arg0, %c0_i32 : i32, i32
  }
  func.func @transform_2(%arg0: i32) -> (i32, i32) {
    %c0_i32 = arith.constant 0 : i32
    %c0_i32_0 = arith.constant 0 : i32
    return %arg0, %c0_i32 : i32, i32
  }
  func.func @transform_3(%arg0: i32) -> (i32, i32) {
    %c0_i32 = arith.constant 0 : i32
    %c0_i32_0 = arith.constant 0 : i32
    return %arg0, %c0_i32 : i32, i32
  }
  func.func @transform_4(%arg0: i32) -> (i32, i32, i32) {
    %c0_i32 = arith.constant 0 : i32
    %c0_i32_0 = arith.constant 0 : i32
    %c0_i32_1 = arith.constant 0 : i32
    return %arg0, %c0_i32, %c0_i32_0 : i32, i32, i32
  }
}

</mosaic_0001>

<bundles_post_ra>
// kernel: tpu_custom_call.1
= control target key start
LH: loop header
LB: loop body
LE: loop exit
PB: predicated region body
PF: predicated region fallthrough
CT: control target
= control target key end

     0   :  { %9 = vsyncpa [#allocation3], 0  ;;  %s291_s0 = inlined_call_operand.hbm [shape: f32[8,16], index: 0, kind: input, shape index: {}]   ;;  %s292_s1 = inlined_call_operand.hbm [shape: f32[8,8], index: 1, kind: input, shape index: {}]   ;;  %s293_s2 = inlined_call_operand.hbm [shape: f32[8,8], index: 2, kind: input, shape index: {}]   ;;  %s294_s3 = inlined_call_operand.vmem [shape: f32[8,8], index: 3, kind: input, shape index: {}]   ;;  %s295_s4 = inlined_call_operand.hbm [shape: f32[1,1,1], index: 4, kind: output, shape index: {}]  }
   0x1   :  { %10 = vsyncpa [#allocation6], 0 }
   0x2   :  { %11 = vsyncpa [#allocation4], 0  ;;  %s209_s15 = smov [#allocation5]   ;;  %s210_s17 = smov [#allocation2]  }
   0x3   :  { %s28_s16 = sshll.u32 %s209_s15, 4  ;;  %s18_s18 = sshll.u32 %s210_s17, 4  ;;  %s29_s16 = int_to_ptr.vmem [resolvable:$true] %s28_s16  ;;  %s19_s18 = int_to_ptr.vmem [resolvable:$true] %s18_s18 }
   0x4   :  { %s115_s21 = scalar_lea.hbm %s292_s1, 128 }
   0x5   :  { %p116_p0 = scmp.ne.s32.totalorder %s292_s1, %s115_s21  ;;  %p119_p1 = scmp.lt.u32.totalorder %s115_s21, %s292_s1 }
   0x7   :  { %p121_p2 = pnand %p119_p1, %p116_p0 }
   0x9   :  { %124 = shalt.err (!%p121_p2)
}
   0xa   :  { %s125_s26 = scalar_lea.vmem %s29_s16, 128  ;;  %p130_p4 = scmp.lt.s32.totalorder %s29_s16, %s29_s16 }
   0xb   :  { %p126_p3 = scmp.ne.s32.totalorder %s29_s16, %s125_s26  ;;  %p131_p5 = scmp.lt.s32.totalorder %s125_s26, %s125_s26 }
   0xd   :  { %p132_p6 = por %p131_p5, %p130_p4 }
   0xf   :  { %p133_p7 = pnand %p132_p6, %p126_p3 }
  0x11   :  { %136 = shalt.err (!%p133_p7)
}
  0x12   :  { %31 = dma.hbm_to_vmem [thread:$0]  %s292_s1, 128, %s29_s16, [#allocation6]  }
  0x13   :  { %s137_s5 = scalar_lea.hbm %s291_s0, 128 }
  0x14   :  { %p138_p8 = scmp.ne.s32.totalorder %s291_s0, %s137_s5  ;;  %p141_p9 = scmp.lt.u32.totalorder %s137_s5, %s291_s0 }
  0x16   :  { %p143_p10 = pnand %p141_p9, %p138_p8 }
  0x18   :  { %146 = shalt.err (!%p143_p10)
}
  0x19   :  { %s147_s10 = scalar_lea.vmem %s19_s18, 128  ;;  %p152_p12 = scmp.lt.s32.totalorder %s19_s18, %s19_s18 }
  0x1a   :  { %p148_p11 = scmp.ne.s32.totalorder %s19_s18, %s147_s10  ;;  %p153_p13 = scmp.lt.s32.totalorder %s147_s10, %s147_s10 }
  0x1c   :  { %p154_p0 = por %p153_p13, %p152_p12 }
  0x1e   :  { %p155_p1 = pnand %p154_p0, %p148_p11 }
  0x20   :  { %158 = shalt.err (!%p155_p1)
}
  0x21   :  { %21 = dma.hbm_to_vmem [thread:$0]  %s291_s0, 128, %s19_s18, [#allocation3]  }
  0x22   :  { %s211_s12 = smov [#allocation7]   ;;  %s159_s16 = scalar_lea.hbm %s293_s2, 128 }
  0x23   :  { %s38_s13 = sshll.u32 %s211_s12, 4  ;;  %p160_p2 = scmp.ne.s32.totalorder %s293_s2, %s159_s16  ;;  %s39_s13 = int_to_ptr.vmem [resolvable:$true] %s38_s13 }
  0x24   :  { %p163_p3 = scmp.lt.u32.totalorder %s159_s16, %s293_s2 }
  0x26   :  { %p165_p4 = pnand %p163_p3, %p160_p2 }
  0x28   :  { %168 = shalt.err (!%p165_p4)
}
  0x29   :  { %s169_s22 = scalar_lea.vmem %s39_s13, 128  ;;  %p174_p6 = scmp.lt.s32.totalorder %s39_s13, %s39_s13 }
  0x2a   :  { %p170_p5 = scmp.ne.s32.totalorder %s39_s13, %s169_s22  ;;  %p175_p7 = scmp.lt.s32.totalorder %s169_s22, %s169_s22 }
  0x2c   :  { %p176_p8 = por %p175_p7, %p174_p6 }
  0x2e   :  { %p177_p9 = pnand %p176_p8, %p170_p5 }
  0x30   :  { %180 = shalt.err (!%p177_p9)
}
  0x31   :  { %41 = dma.hbm_to_vmem [thread:$0]  %s293_s2, 128, %s39_s13, [#allocation6]  }
  0x32   :  { %203 = dma.done.wait [#allocation3], 128  }
  0x33   :  { %204 = vsyncadd [#allocation3], 4294967168 }
  0x34   :  { %205 = dma.done.wait [#allocation6], 256  }
  0x35   :  { %206 = vsyncadd [#allocation6], 4294967040  ;;  %v53_v0 = vld [vmem:[#allocation2] sm:$0xff]  ;;  %s212_s23 = smov 2   ;;  %s213_s24 = smov 126   ;;  %vm67_vm0 = vcmask 113664  }
  0x36   :  { %58 = vrot.lane.b32.xlu0 %v53_v0, %s212_s23  ;;  %v54_v8 = vld [vmem:[#allocation5] sm:$0xff]  ;;  %v55_v9 = vld [vmem:[#allocation7] sm:$0xff]  ;;  %v56_v11 = vld [vmem:[%s294_s3] sm:$0xff]  ;;  %vm79_vm2 = vcmask 64512   ;;  %s214_s26 = smov [#allocation8]   ;;  %vm89_vm3 = vcmask 0  }
  0x37   :  { %v75_v10 = vsub.f32 %v54_v8, %v55_v9  ;;  %s97_s27 = sshll.u32 %s214_s26, 4  ;;  %s98_s27 = int_to_ptr.vmem [resolvable:$true] %s97_s27 }
  0x38   :  { %s181_s3 = scalar_lea.vmem %s98_s27, 16  ;;  %s185_s28 = scalar_lea.vmem %s98_s27, 32 }
  0x39   :  { %v76_v13 = vand.u32 2147483647, %v75_v10  ;;  %p182_p10 = scmp.ne.s32.totalorder %s98_s27, %s181_s3  ;;  %p186_p11 = scmp.lt.s32.totalorder %s98_s27, %s98_s27 }
  0x3a   :  { %p187_p12 = scmp.lt.s32.totalorder %s185_s28, %s181_s3 }
  0x3c   :  { %p188_p13 = por %p187_p12, %p186_p11 }
  0x3e   :  { %p189_p0 = pnand %p188_p13, %p182_p10 }
  0xa8   :  { %v59_v1 = vpop.permute.xlu0 %58 }
  0xa9   :  { %v61_v2 = vsub.f32 %v53_v0, %v59_v1 }
  0xab   :  { %v62_v3 = vand.u32 2147483647, %v61_v2 }
  0xad   :  { %64 = vrot.lane.b32.xlu0 %v62_v3, %s213_s24 }
 0x11f   :  { %v65_v4 = vpop.permute.xlu0 %64 }
 0x120   :  { %v68_v5 = vsel %vm67_vm0, %v65_v4, 0.0 }
 0x121   :  { %69 = vadd.xlane.f32.xlu1 %v68_v5 }
 0x1ae   :  { %v70_v6 = vpop.xlane.xlu1 %69 }
 0x1af   :  { %v71_v7 = vmul.f32 0.071428575, %v70_v6 }
 0x1b1   :  { %113 = vrcp.f32 %v71_v7  ;;  %vm72_vm1 = vcmp.gt.f32.partialorder %v71_v7, 0.0 }
 0x1bb   :  { %v114_v12 = vpop.eup %113 }
 0x1bc   :  { %v74_v14 = vsel %vm72_vm1, %v114_v12, 0.0 }
 0x1bd   :  { %v77_v15 = vmul.f32 %v74_v14, %v56_v11 }
 0x1bf   :  { %v78_v16 = vmul.f32 %v77_v15, %v76_v13 }
 0x1c1   :  { %v80_v17 = vsel %vm79_vm2, %v78_v16, 0.0 }
 0x1c2   :  { %81 = vadd.xlane.f32.xlu1 %v80_v17 }
 0x24f   :  { %v82_v18 = vpop.xlane.xlu1 %81 }
 0x250   :  { %v83_v19 = vrot.slane %v82_v18, 4 }
 0x252   :  { %v84_v20 = vadd.f32 %v83_v19, %v82_v18 }
 0x254   :  { %v85_v21 = vrot.slane %v84_v20, 2 }
 0x256   :  { %v86_v22 = vadd.f32 %v85_v21, %v84_v20 }
 0x258   :  { %v87_v23 = vrot.slane %v86_v22, 1 }
 0x25a   :  { %v88_v24 = vadd.f32 %v87_v23, %v86_v22 }
 0x25c   :  { %90 = vst.msk [vmem:[#allocation8] sm:$0x1] %vm89_vm3, %v88_v24 }
 0x25d   :  { %192 = shalt.err (!%p189_p0)
}
 0x25e   :  { %s193_s5 = scalar_lea.hbm %s295_s4, 16 }
 0x25f   :  { %p194_p1 = scmp.ne.s32.totalorder %s295_s4, %s193_s5  ;;  %p197_p2 = scmp.lt.u32.totalorder %s193_s5, %s295_s4 }
 0x261   :  { %p199_p3 = pnand %p197_p2, %p194_p1 }
 0x263   :  { %202 = shalt.err (!%p199_p3)
}
 0x264   :  { %100 = dma.vmem_to_hbm [thread:$0]  %s98_s27, 16, %s295_s4, [#allocation4]  }
 0x265   :  { %207 = dma.done.wait [#allocation4], 16  }
 0x266   :  { %208 = vsyncadd [#allocation4], 4294967280 }
 0x267   :  { %104 = vsyncpa [#allocation3], 1 }
 0x268   :  { %105 = vsyncpa [#allocation6], 1 }
 0x269   :  { %106 = vsyncpa [#allocation4], 1 }

</bundles_post_ra>
